<compile_context>
chip_gen: v7x
topology: tpu7x:2x2x1
jax: 0.10.0
libtpu: 0.0.40
codegen_flags: <defaults>
</compile_context>

<pallas_src>
import functools

import jax
import jax.numpy as jnp
from jax.experimental import pallas as pl
from jax.experimental.pallas import tpu as pltpu

IN_DIM = 7
IN_PAD = 8          # feature dim padded to a sublane multiple (extra zero col)
H1, H2, H3 = 64, 128, 64
OUT_DIM = 1
OUT_LANES = 128     # lane-dense output slab; column 0 carries mu


def policy_kernel(x_ref, w1_ref, w2_ref, w3_ref, wmu_ref, b_ref, out_ref):
    # Packed biases (single DMA): row 0 -> b1, row 1 -> b2, row 2 -> b3, row 3 -> b_mu.
    b1 = b_ref[0:1, 0:H1]
    b2 = b_ref[1:2, 0:H2]
    b3 = b_ref[2:3, 0:H3]
    bmu = b_ref[3:4, 0:1]

    # fc1 + relu (tiny 8x64 layer, kept f32)
    h = jnp.dot(x_ref[...], w1_ref[...], preferred_element_type=jnp.float32) + b1
    h = jnp.maximum(h, 0.0)
    # fc2 + relu (bf16 weights, f32 MXU accumulation)
    h = jnp.dot(h.astype(jnp.bfloat16), w2_ref[...],
                preferred_element_type=jnp.float32) + b2
    h = jnp.maximum(h, 0.0)
    # fc3 + relu (bf16 weights, f32 MXU accumulation)
    h = jnp.dot(h.astype(jnp.bfloat16), w3_ref[...],
                preferred_element_type=jnp.float32) + b3
    h = jnp.maximum(h, 0.0)
    # fc_mu + tanh: N=1 output -> VPU multiply + XLU lane reduce (no MXU drain).
    mu = jnp.sum(h * wmu_ref[...], axis=-1, keepdims=True) + bmu
    mu = jnp.tanh(mu)
    # Lane-dense store (avoids masked vst for a width-1 output).
    out_ref[...] = jnp.broadcast_to(mu, out_ref.shape).astype(out_ref.dtype)


def pack_params(params):
    """One-time prep of kernel-ready params (do NOT redo this per call)."""
    w1 = jnp.zeros((IN_PAD, H1), jnp.float32)
    w1 = w1.at[:IN_DIM, :].set(params["w1"].astype(jnp.float32))   # [8, 64]
    packed = {
        "w1": w1,
        "w2": params["w2"].astype(jnp.bfloat16),                   # [64, 128]
        "w3": params["w3"].astype(jnp.bfloat16),                   # [128, 64]
        "wmu_row": params["wmu"].reshape(1, H3).astype(jnp.float32),  # [1, 64]
    }
    b = jnp.zeros((4, 128), jnp.float32)
    b = b.at[0, :H1].set(params["b1"].reshape(-1))
    b = b.at[1, :H2].set(params["b2"].reshape(-1))
    b = b.at[2, :H3].set(params["b3"].reshape(-1))
    b = b.at[3, 0].set(params["bmu"].reshape(-1)[0])
    packed["bias"] = b
    return packed


def _round_up(n, m):
    return ((n + m - 1) // m) * m


@functools.partial(jax.jit, static_argnames=("tb",))
def policy_forward(x, packed, *, tb=128):
    """x: [B, 7] float32.  packed: output of pack_params.  Returns [B, 1] f32.

    tb: max batch tile (rows per grid step).  The effective tile shrinks to the
    (8-aligned) batch size for small batches so no padded compute is wasted.
    """
    B = x.shape[0]
    tb_eff = min(tb, _round_up(B, 8))
    n_blocks = -(-B // tb_eff)
    b_pad = n_blocks * tb_eff
    x = jnp.pad(x.astype(jnp.float32),
                ((0, b_pad - B), (0, IN_PAD - x.shape[1])))

    flops = 2 * b_pad * (IN_PAD * H1 + H1 * H2 + H2 * H3 + H3 * OUT_DIM)
    param_bytes = sum(a.size * a.dtype.itemsize for a in packed.values())
    bytes_accessed = x.size * 4 + param_bytes + b_pad * OUT_LANES * 4

    out = pl.pallas_call(
        policy_kernel,
        out_shape=jax.ShapeDtypeStruct((b_pad, OUT_LANES), jnp.float32),
        grid_spec=pltpu.PrefetchScalarGridSpec(
            num_scalar_prefetch=0,
            grid=(n_blocks,),
            in_specs=[
                pl.BlockSpec((tb_eff, IN_PAD), lambda i: (i, 0)),  # x: batch-tiled
                pl.BlockSpec((IN_PAD, H1), lambda i: (0, 0)),      # weights: VMEM-resident
                pl.BlockSpec((H1, H2), lambda i: (0, 0)),
                pl.BlockSpec((H2, H3), lambda i: (0, 0)),
                pl.BlockSpec((1, H3), lambda i: (0, 0)),
                pl.BlockSpec((4, 128), lambda i: (0, 0)),          # packed biases (1 DMA)
            ],
            out_specs=pl.BlockSpec((tb_eff, OUT_LANES), lambda i: (i, 0)),
        ),
        compiler_params=pltpu.CompilerParams(
            dimension_semantics=("parallel",),   # shard batch tiles across TCs (v7x)
        ),
        cost_estimate=pl.CostEstimate(
            flops=flops, transcendentals=b_pad, bytes_accessed=bytes_accessed),
    )(x, packed["w1"], packed["w2"], packed["w3"], packed["wmu_row"], packed["bias"])
    return out[:B, :OUT_DIM]


def init_params(key):
    """Deterministic init mimicking nn.Linear default (uniform +/- 1/sqrt(fan_in))."""
    sizes = [(IN_DIM, H1), (H1, H2), (H2, H3), (H3, OUT_DIM)]
    names = ["1", "2", "3", "mu"]
    params = {}
    for (fan_in, fan_out), name in zip(sizes, names):
        key, kw, kb = jax.random.split(key, 3)
        bound = 1.0 / (fan_in ** 0.5)
        # stored as [in, out] (transposed relative to PyTorch's [out, in])
        params["w" + name] = jax.random.uniform(
            kw, (fan_in, fan_out), jnp.float32, -bound, bound)
        params["b" + name] = jax.random.uniform(
            kb, (1, fan_out), jnp.float32, -bound, bound)
    return params


def reference_forward(x, params):
    h = jnp.maximum(x @ params["w1"] + params["b1"], 0.0)
    h = jnp.maximum(h @ params["w2"] + params["b2"], 0.0)
    h = jnp.maximum(h @ params["w3"] + params["b3"], 0.0)
    return jnp.tanh(h @ params["wmu"] + params["bmu"])


if __name__ == "__main__":
    key = jax.random.PRNGKey(0)
    params = init_params(key)
    packed = pack_params(params)   # one-time weight prep (bf16 cast, bias packing)

    ok = True
    # Small act()-style batch (single-block path) and a multi-block, non-aligned
    # replay batch (exercises grid > 1 and batch padding).
    for batch in (8, 200):
        key, kx = jax.random.split(key)
        x = jax.random.normal(kx, (batch, IN_DIM), jnp.float32)

        mu = policy_forward(x, packed)
        mu = jax.block_until_ready(mu)

        ref = reference_forward(x, params)
        assert mu.shape == (batch, OUT_DIM)
        # w2/w3 are bf16 -> loosen tolerance vs the pure-f32 reference.
        close = bool(jnp.allclose(mu, ref, atol=2e-2, rtol=2e-2))
        assert close, float(jnp.max(jnp.abs(mu - ref)))
        ok = ok and close

    if ok:
        print("KERNEL_OK")
</pallas_src>

<mosaic_0001>
module attributes {stable_mosaic.version = 11 : i64} {
  func.func @policy_kernel(%arg0: i32, %arg1: memref<8x8xf32, #tpu.memory_space<vmem>>, %arg2: memref<8x64xf32, #tpu.memory_space<vmem>>, %arg3: memref<64x128xbf16, #tpu.memory_space<vmem>>, %arg4: memref<128x64xbf16, #tpu.memory_space<vmem>>, %arg5: memref<1x64xf32, #tpu.memory_space<vmem>>, %arg6: memref<4x128xf32, #tpu.memory_space<vmem>>, %arg7: memref<8x128xf32, #tpu.memory_space<vmem>>) attributes {dimension_semantics = [#tpu.dimension_semantics<parallel>], iteration_bounds = array<i64: 1>, scalar_prefetch = 0 : i64, scratch_operands = 0 : i64, tpu.core_type = #tpu.core_type<tc>, window_params = [{transform_indices = @transform_0, window_bounds = array<i64: 8, 8>}, {pipeline_mode = #tpu.pipeline_mode<synchronous>, transform_indices = @transform_1, window_bounds = array<i64: 8, 64>}, {pipeline_mode = #tpu.pipeline_mode<synchronous>, transform_indices = @transform_2, window_bounds = array<i64: 64, 128>}, {pipeline_mode = #tpu.pipeline_mode<synchronous>, transform_indices = @transform_3, window_bounds = array<i64: 128, 64>}, {pipeline_mode = #tpu.pipeline_mode<synchronous>, transform_indices = @transform_4, window_bounds = array<i64: 1, 64>}, {pipeline_mode = #tpu.pipeline_mode<synchronous>, transform_indices = @transform_5, window_bounds = array<i64: 4, 128>}, {transform_indices = @transform_6, window_bounds = array<i64: 8, 128>}]} {
    %c0 = arith.constant 0 : index
    %c0_0 = arith.constant 0 : index
    %0 = vector.load %arg6[%c0, %c0_0] : memref<4x128xf32, #tpu.memory_space<vmem>>, vector<1x64xf32>
    %c1 = arith.constant 1 : index
    %c0_1 = arith.constant 0 : index
    %1 = vector.load %arg6[%c1, %c0_1] : memref<4x128xf32, #tpu.memory_space<vmem>>, vector<1x128xf32>
    %c2 = arith.constant 2 : index
    %c0_2 = arith.constant 0 : index
    %2 = vector.load %arg6[%c2, %c0_2] : memref<4x128xf32, #tpu.memory_space<vmem>>, vector<1x64xf32>
    %c3 = arith.constant 3 : index
    %c0_3 = arith.constant 0 : index
    %3 = vector.load %arg6[%c3, %c0_3] : memref<4x128xf32, #tpu.memory_space<vmem>>, vector<1x1xf32>
    %c0_4 = arith.constant 0 : index
    %c0_5 = arith.constant 0 : index
    %4 = vector.load %arg1[%c0_4, %c0_5] : memref<8x8xf32, #tpu.memory_space<vmem>>, vector<8x8xf32>
    %c0_6 = arith.constant 0 : index
    %c0_7 = arith.constant 0 : index
    %5 = vector.load %arg2[%c0_6, %c0_7] : memref<8x64xf32, #tpu.memory_space<vmem>>, vector<8x64xf32>
    %cst = arith.constant dense<0.000000e+00> : vector<8x64xf32>
    %6 = tpu.matmul %4, %5, %cst {dimension_numbers = #tpu.dot_dimension_numbers<[1], [0], [0], [1], [0, 0, 1, 1], [], []>} : vector<8x8xf32>, vector<8x64xf32>, vector<8x64xf32> -> vector<8x64xf32>
    %7 = vector.broadcast %0 : vector<1x64xf32> to vector<8x64xf32>
    %8 = arith.addf %6, %7 : vector<8x64xf32>
    %cst_8 = arith.constant 0.000000e+00 : f32
    %9 = vector.broadcast %cst_8 : f32 to vector<8x64xf32>
    %10 = arith.maximumf %8, %9 : vector<8x64xf32>
    %11 = arith.truncf %10 : vector<8x64xf32> to vector<8x64xbf16>
    %c0_9 = arith.constant 0 : index
    %c0_10 = arith.constant 0 : index
    %12 = vector.load %arg3[%c0_9, %c0_10] : memref<64x128xbf16, #tpu.memory_space<vmem>>, vector<64x128xbf16>
    %cst_11 = arith.constant dense<0.000000e+00> : vector<8x128xf32>
    %13 = tpu.matmul %11, %12, %cst_11 {dimension_numbers = #tpu.dot_dimension_numbers<[1], [0], [0], [1], [0, 0, 1, 1], [], []>} : vector<8x64xbf16>, vector<64x128xbf16>, vector<8x128xf32> -> vector<8x128xf32>
    %14 = vector.broadcast %1 : vector<1x128xf32> to vector<8x128xf32>
    %15 = arith.addf %13, %14 : vector<8x128xf32>
    %cst_12 = arith.constant 0.000000e+00 : f32
    %16 = vector.broadcast %cst_12 : f32 to vector<8x128xf32>
    %17 = arith.maximumf %15, %16 : vector<8x128xf32>
    %18 = arith.truncf %17 : vector<8x128xf32> to vector<8x128xbf16>
    %c0_13 = arith.constant 0 : index
    %c0_14 = arith.constant 0 : index
    %19 = vector.load %arg4[%c0_13, %c0_14] : memref<128x64xbf16, #tpu.memory_space<vmem>>, vector<128x64xbf16>
    %cst_15 = arith.constant dense<0.000000e+00> : vector<8x64xf32>
    %20 = tpu.matmul %18, %19, %cst_15 {dimension_numbers = #tpu.dot_dimension_numbers<[1], [0], [0], [1], [0, 0, 1, 1], [], []>} : vector<8x128xbf16>, vector<128x64xbf16>, vector<8x64xf32> -> vector<8x64xf32>
    %21 = vector.broadcast %2 : vector<1x64xf32> to vector<8x64xf32>
    %22 = arith.addf %20, %21 : vector<8x64xf32>
    %cst_16 = arith.constant 0.000000e+00 : f32
    %23 = vector.broadcast %cst_16 : f32 to vector<8x64xf32>
    %24 = arith.maximumf %22, %23 : vector<8x64xf32>
    %c0_17 = arith.constant 0 : index
    %c0_18 = arith.constant 0 : index
    %25 = vector.load %arg5[%c0_17, %c0_18] : memref<1x64xf32, #tpu.memory_space<vmem>>, vector<1x64xf32>
    %26 = vector.broadcast %25 : vector<1x64xf32> to vector<8x64xf32>
    %27 = arith.mulf %24, %26 : vector<8x64xf32>
    %cst_19 = arith.constant dense<0.000000e+00> : vector<8xf32>
    %28 = vector.multi_reduction <add>, %27, %cst_19 [1] : vector<8x64xf32> to vector<8xf32>
    %29 = vector.shape_cast %28 : vector<8xf32> to vector<8x1xf32>
    %30 = vector.broadcast %3 : vector<1x1xf32> to vector<8x1xf32>
    %31 = arith.addf %29, %30 : vector<8x1xf32>
    %32 = math.tanh %31 : vector<8x1xf32>
    %33 = vector.shape_cast %32 : vector<8x1xf32> to vector<8x1xf32>
    %34 = vector.broadcast %33 : vector<8x1xf32> to vector<8x128xf32>
    %c0_20 = arith.constant 0 : index
    %c0_21 = arith.constant 0 : index
    %35 = vector.load %arg7[%c0_20, %c0_21] : memref<8x128xf32, #tpu.memory_space<vmem>>, vector<8x128xf32>
    tpu.vector_store %arg7[%c0_20, %c0_21], %34 {strides = array<i32>} : memref<8x128xf32, #tpu.memory_space<vmem>>, vector<8x128xf32>,
    return
  }
  func.func @transform_0(%arg0: i32) -> (i32, i32) {
    %c0_i32 = arith.constant 0 : i32
    %c0_i32_0 = arith.constant 0 : i32
    return %arg0, %c0_i32 : i32, i32
  }
  func.func @transform_1(%arg0: i32) -> (i32, i32) {
    %c0_i32 = arith.constant 0 : i32
    %c0_i32_0 = arith.constant 0 : i32
    %c0_i32_1 = arith.constant 0 : i32
    return %c0_i32, %c0_i32_0 : i32, i32
  }
  func.func @transform_2(%arg0: i32) -> (i32, i32) {
    %c0_i32 = arith.constant 0 : i32
    %c0_i32_0 = arith.constant 0 : i32
    %c0_i32_1 = arith.constant 0 : i32
    return %c0_i32, %c0_i32_0 : i32, i32
  }
  func.func @transform_3(%arg0: i32) -> (i32, i32) {
    %c0_i32 = arith.constant 0 : i32
    %c0_i32_0 = arith.constant 0 : i32
    %c0_i32_1 = arith.constant 0 : i32
    return %c0_i32, %c0_i32_0 : i32, i32
  }
  func.func @transform_4(%arg0: i32) -> (i32, i32) {
    %c0_i32 = arith.constant 0 : i32
    %c0_i32_0 = arith.constant 0 : i32
    %c0_i32_1 = arith.constant 0 : i32
    return %c0_i32, %c0_i32_0 : i32, i32
  }
  func.func @transform_5(%arg0: i32) -> (i32, i32) {
    %c0_i32 = arith.constant 0 : i32
    %c0_i32_0 = arith.constant 0 : i32
    %c0_i32_1 = arith.constant 0 : i32
    return %c0_i32, %c0_i32_0 : i32, i32
  }
  func.func @transform_6(%arg0: i32) -> (i32, i32) {
    %c0_i32 = arith.constant 0 : i32
    %c0_i32_0 = arith.constant 0 : i32
    return %arg0, %c0_i32 : i32, i32
  }
}

</mosaic_0001>

<bundles_post_ra>
// kernel: policy_forward.1
= control target key start
LH: loop header
LB: loop body
LE: loop exit
PB: predicated region body
PF: predicated region fallthrough
CT: control target
= control target key end

     0   :  { %vm34_vm0 = vcmask 64512   ;;  %v418_v0 = vmov 0.0   ;;  %vm419_vm1 = vmmov 0   ;;  %vm146_vm2 = vcmask 523264   ;;  %s518_s1 = inlined_call_operand.vmem [shape: f32[8,64], index: 1, kind: input, shape index: {}]   ;;  %s519_s0 = inlined_call_operand.vmem [shape: f32[8,8], index: 0, kind: input, shape index: {}]   ;;  %s520_s2 = inlined_call_operand.vmem [shape: bf16[64,128], index: 2, kind: input, shape index: {}]   ;;  %s521_s3 = inlined_call_operand.vmem [shape: bf16[128,64], index: 3, kind: input, shape index: {}]   ;;  %s522_s5 = inlined_call_operand.vmem [shape: f32[4,128], index: 5, kind: input, shape index: {}]   ;;  %s523_s4 = inlined_call_operand.vmem [shape: f32[1,64], index: 4, kind: input, shape index: {}]   ;;  %s524_s6 = inlined_call_operand.vmem [shape: f32[8,128], index: 6, kind: output, shape index: {}]  }
   0x1   :  { %363 = vmatprep.subr.mxu1 %v418_v0  ;;  %v29_v1 = vld [vmem:[%s518_s1] sm:$0xff]  ;;  %365 = vmatprep.mubr.msk.f32.mxu1 %vm419_vm1, %v418_v0  ;;  %v405_v4 = vld [vmem:[%s520_s2 + $0x8] sm:$0xff]   ;;  %v406_v5 = vld [vmem:[%s520_s2 + $0x10] sm:$0xff]   ;;  %v420_v39 = vmov 0  }
   0x2   :  { %v28_v2 = vld [vmem:[%s519_s0] sm:$0xff]  ;;  %364 = vmatpush3.msra.mxu1 %v29_v1  ;;  %380 = vmatprep.subr.bf16.mxu0 %v418_v0  ;;  %v407_v6 = vld [vmem:[%s520_s2 + $0x18] sm:$0xff]   ;;  %v409_v8 = vld [vmem:[%s521_s3 + $0x8] sm:$0xff]  }
   0x3   :  { %v404_v3 = vld [vmem:[%s520_s2] sm:$0xff]   ;;  %366 = vmatmul.mubr.msk.f32.vlgmr.msra.gmra.mrb[0].mxu1 %vm34_vm0, %v28_v2  ;;  %368 = vmatprep.subr.bf16.mxu1 %v418_v0  ;;  %v410_v9 = vld [vmem:[%s521_s3 + $0x10] sm:$0xff]   ;;  %v411_v10 = vld [vmem:[%s521_s3 + $0x18] sm:$0xff]  }
   0x4   :  { %369 = vmatpush3.bf16.msra.mxu1 %v404_v3  ;;  %376 = vmatprep.mubr.msk.bf16.mxu1 %vm419_vm1, %v418_v0  ;;  %v408_v7 = vld [vmem:[%s521_s3] sm:$0xff]   ;;  %v413_v12 = vld [vmem:[%s521_s3 + $0x28] sm:$0xff]   ;;  %v414_v19 = vld [vmem:[%s521_s3 + $0x30] sm:$0xff]  }
   0x5   :  { %370 = vmatprep.subr.bf16.mxu1 %v418_v0  ;;  %396 = vmatprep.mubr.msk.bf16.mxu0 %vm419_vm1, %v418_v0  ;;  %v412_v11 = vld [vmem:[%s521_s3 + $0x20] sm:$0xff]   ;;  %v415_v20 = vld [vmem:[%s521_s3 + $0x38] sm:$0xff]  }
   0x6   :  { %381 = vmatpush3.bf16.msra.mxu0 %v408_v7  ;;  %v328_v13 = vld [vmem:[%s522_s5] ss:$0 sm:$0xff]  ;;  %v330_v21 = vld [vmem:[%s522_s5 + $0x1] ss:$0 sm:$0xff]  ;;  %v336_v29 = vld [vmem:[%s522_s5 + $0x2] ss:$0 sm:$0xff]  ;;  %403 = vset.pattern.permute.xlu0 %v420_v39 }
   0x7   :  { %382 = vmatprep.subr.bf16.mxu0 %v418_v0  ;;  %v345_v34 = vld [vmem:[%s523_s4] ss:$0 sm:$0xff]  ;;  %v346_v40 = vld [vmem:[%s522_s5 + $0x3] ss:$0 sm:$0xff] }
   0x8   :  { %371 = vmatpush3.bf16.msra.mxu1 %v405_v4 }
   0x9   :  { %372 = vmatprep.subr.bf16.mxu1 %v418_v0 }
   0xa   :  { %383 = vmatpush3.bf16.msra.mxu0 %v409_v8 }
   0xb   :  { %384 = vmatprep.subr.bf16.mxu0 %v418_v0 }
   0xc   :  { %373 = vmatpush3.bf16.msra.mxu1 %v406_v5 }
   0xd   :  { %374 = vmatprep.subr.bf16.mxu1 %v418_v0 }
   0xe   :  { %385 = vmatpush3.bf16.msra.mxu0 %v410_v9 }
   0xf   :  { %386 = vmatprep.subr.bf16.mxu0 %v418_v0 }
  0x10   :  { %375 = vmatpush3.bf16.msra.mxu1 %v407_v6 }
  0x12   :  { %387 = vmatpush3.bf16.msra.mxu0 %v411_v10 }
  0x13   :  { %388 = vmatprep.subr.bf16.mxu0 %v418_v0 }
  0x16   :  { %389 = vmatpush3.bf16.msra.mxu0 %v412_v11 }
  0x17   :  { %390 = vmatprep.subr.bf16.mxu0 %v418_v0 }
  0x1a   :  { %391 = vmatpush3.bf16.msra.mxu0 %v413_v12 }
  0x1b   :  { %392 = vmatprep.subr.bf16.mxu0 %v418_v0 }
  0x1e   :  { %393 = vmatpush3.bf16.msra.mxu0 %v414_v19 }
  0x1f   :  { %394 = vmatprep.subr.bf16.mxu0 %v418_v0 }
  0x22   :  { %395 = vmatpush3.bf16.msra.mxu0 %v415_v20 }
  0xd6   :  { %v104_v14 = vpop.f32.mrb[0].mxu1 }
  0xd7   :  { %v105_v15 = vadd.f32 %v328_v13, %v104_v14  ;;  %v367_v16 = vpop.f32.mrb[1].mxu1 }
  0xd9   :  { %v108_v17 = vmax.f32 %v105_v15, 0.0 }
  0xdb   :  { %v109_v18 = vpack.c.bf16 %v108_v17, %v108_v17 }
  0xdd   :  { %377 = vmatmul.mubr.msk.bf16.vlgmr.msra.gmra.mrb[4].mxu1 %vm146_vm2, %v109_v18 }
 0x1b0   :  { %v184_v22 = vpop.f32.mrb[4].mxu1 }
 0x1b1   :  { %v185_v23 = vadd.f32 %v330_v21, %v184_v22  ;;  %v378_v24 = vpop.f32.mrb[5].mxu1 }
 0x1b2   :  { %v187_v25 = vpop.f32.mrb[6].mxu1 }
 0x1b3   :  { %v190_v26 = vmax.f32 %v185_v23, 0.0  ;;  %v379_v27 = vpop.f32.mrb[7].mxu1 }
 0x1b5   :  { %v191_v28 = vpack.c.bf16 %v190_v26, %v190_v26 }
 0x1b7   :  { %397 = vmatmul.mubr.bf16.vlgmr.msra.gmra.mrb[0].mxu0 %v191_v28 }
 0x28a   :  { %v294_v30 = vpop.f32.mrb[0].mxu0 }
 0x28b   :  { %v295_v31 = vadd.f32 %v336_v29, %v294_v30  ;;  %v398_v32 = vpop.f32.mrb[1].mxu0 }
 0x28c   :  { %v297_v33 = vpop.f32.mrb[2].mxu0 }
 0x28d   :  { %v300_v35 = vmax.f32 %v295_v31, 0.0  ;;  %v399_v36 = vpop.f32.mrb[3].mxu0 }
 0x28f   :  { %v308_v37 = vmul.f32 %v345_v34, %v300_v35 }
 0x291   :  { %v309_v38 = vsel %vm146_vm2, %v308_v37, 0.0 }
 0x292   :  { %310 = vadd.xlane.f32.xlu0 %v309_v38 }
 0x31f   :  { %v311_v41 = vpop.xlane.xlu0 %310 }
 0x320   :  { %v316_v42 = vadd.f32 %v346_v40, %v311_v41 }
 0x322   :  { %416 = vtanh.f32 %v316_v42 }
 0x32c   :  { %v417_v43 = vpop.eup %416 }
 0x32d   :  { %320 = vperm.xlu0 %403, %v417_v43  }
 0x3ac   :  { %v321_v44 = vpop.permute.xlu0 %320 }
 0x3ad   :  { %323 = vst [vmem:[%s524_s6] sm:$0xff] %v321_v44 }

</bundles_post_ra>
